<compile_context>
chip_gen: v7x
topology: tpu7x:2x2x1
jax: 0.10.0
libtpu: 0.0.40
codegen_flags: <defaults>
</compile_context>

<pallas_src>
import math

import jax
import jax.numpy as jnp
from jax.experimental import pallas as pl
from jax.experimental.pallas import tpu as pltpu


def _cdiv(a, b):
    return -(-a // b)


def _make_composite_diag_kernel(num_ops):
    """Kernel applying `num_ops` diagonal operators to one tile.

    refs = (d_ref_0, ..., d_ref_{K-1}, x_ref, o_ref), each (tile_rows, LANES).
    """

    def kernel(*refs):
        d_refs = refs[:num_ops]
        x_ref = refs[num_ops]
        o_ref = refs[num_ops + 1]
        acc = x_ref[...]
        # CompositeLinearSystem.forward: apply each operator in list order.
        # K is static -> unrolled; pure VPU elementwise work, hidden under DMA.
        for d_ref in d_refs:
            acc = acc * d_ref[...]
        o_ref[...] = acc

    return kernel


def composite_linear_forward(diagonals, x, *, min_pallas_elems=8 * 128):
    """Forward pass of a CompositeLinearSystem built from diagonal operators.

    diagonals: list of arrays, each the same shape/dtype as x (the diagonal of
               one operator in the composition, applied in list order).
    x:         input tensor, e.g. NCHW [B, C, H, W].
    """
    assert isinstance(diagonals, list) and len(diagonals) > 0, \
        "At least one operator should be provided."
    for d in diagonals:
        assert d.shape == x.shape, "Each diagonal must match x's shape."
        assert d.dtype == x.dtype, "Each diagonal must match x's dtype."

    orig_shape = x.shape
    total = math.prod(orig_shape)
    K = len(diagonals)
    dtype_bytes = jnp.dtype(x.dtype).itemsize

    # Tiny-problem fast path: a standalone pallas_call's fixed cost swamps the
    # work; XLA's fused elementwise chain is strictly better here.
    if total < min_pallas_elems:
        out = x
        for d in diagonals:
            out = out * d
        return out

    # --- lane-dense flattening -------------------------------------------
    # Pick the widest lane dim in {512, 256, 128} that divides total so the
    # reshape is free and no padding pass is needed.  Fall back to 128 + pad
    # only for awkward sizes.
    LANES = None
    for cand in (512, 256, 128):
        if total % cand == 0:
            LANES = cand
            break
    if LANES is None:
        LANES = 128
    rows = _cdiv(total, LANES)
    padded_total = rows * LANES

    x_flat = x.reshape(-1)
    d_flats = [d.reshape(-1) for d in diagonals]
    if padded_total != total:
        pad = padded_total - total
        x_flat = jnp.pad(x_flat, (0, pad))
        d_flats = [jnp.pad(d, (0, pad)) for d in d_flats]

    x2 = x_flat.reshape(rows, LANES)
    d2s = [d.reshape(rows, LANES) for d in d_flats]

    # --- block sizing by bytes --------------------------------------------
    # Packed sublane tile per dtype (f32:8, bf16:16, int8/fp8:32).
    sublane = {1: 32, 2: 16, 4: 8}.get(dtype_bytes, 8)
    row_bytes = LANES * dtype_bytes

    vmem_budget = 40 * 1024 * 1024          # double-buffered working-set cap
    per_block_target = min(4 * 1024 * 1024, vmem_budget // (2 * (K + 2)))
    target_rows = max(sublane, (per_block_target // row_bytes) // sublane * sublane)

    if rows <= target_rows:
        tile_rows = rows                    # one block covering all rows
    else:
        tile_rows = target_rows             # partial last block is fine

    grid_steps = _cdiv(rows, tile_rows)

    # Ensure >= 2 grid steps when feasible so v7x's two TensorCores both
    # engage on the "parallel" axis.
    if grid_steps == 1 and rows >= 2 * sublane:
        tile_rows = max(sublane, _cdiv(_cdiv(rows, 2), sublane) * sublane)
        grid_steps = _cdiv(rows, tile_rows)

    tile_spec = pl.BlockSpec((tile_rows, LANES), lambda i: (i, 0))

    out2 = pl.pallas_call(
        _make_composite_diag_kernel(K),
        out_shape=jax.ShapeDtypeStruct((rows, LANES), x.dtype),
        grid=(grid_steps,),
        in_specs=[tile_spec] * K + [tile_spec],
        out_specs=tile_spec,
        compiler_params=pltpu.CompilerParams(
            dimension_semantics=("parallel",),
            vmem_limit_bytes=48 * 1024 * 1024,
        ),
        cost_estimate=pl.CostEstimate(
            flops=K * total,
            transcendentals=0,
            bytes_accessed=(K + 2) * total * dtype_bytes,
        ),
    )(*d2s, x2)

    if padded_total != total:
        return out2.reshape(-1)[:total].reshape(orig_shape)
    return out2.reshape(orig_shape)


if __name__ == "__main__":
    key = jax.random.PRNGKey(0)
    k1, k2, k3, kx = jax.random.split(key, 4)

    B, C, H, W = 2, 4, 16, 16
    # Composite of three diagonal linear operators (applied in list order).
    d1 = jax.random.normal(k1, (B, C, H, W), dtype=jnp.float32) + 2.0
    d2 = jax.random.normal(k2, (B, C, H, W), dtype=jnp.float32) + 2.0
    d3 = jax.random.normal(k3, (B, C, H, W), dtype=jnp.float32) + 2.0
    x = jax.random.normal(kx, (B, C, H, W), dtype=jnp.float32)

    out = composite_linear_forward([d1, d2, d3], x)
    out = jax.block_until_ready(out)

    # Reference: CompositeLinearSystem.forward == op3(op2(op1(x))).
    ref = d3 * (d2 * (d1 * x))
    assert out.shape == x.shape
    assert jnp.allclose(out, ref, atol=1e-5, rtol=1e-5)

    # TODO(synk): the generic LinearSystem machinery (autograd-based transpose,
    # conjugate/conjugate-transpose wrappers, conjugate-gradient pseudoinverse)
    # is host-side composition logic over arbitrary nested operators, not a
    # single kernel; only the fused forward chain of concrete diagonal
    # operators is implemented here.

    print("KERNEL_OK")
</pallas_src>

<mosaic_0001>
module attributes {stable_mosaic.version = 11 : i64} {
  func.func @kernel(%arg0: i32, %arg1: memref<4x512xf32, #tpu.memory_space<vmem>>, %arg2: memref<4x512xf32, #tpu.memory_space<vmem>>, %arg3: memref<4x512xf32, #tpu.memory_space<vmem>>, %arg4: memref<4x512xf32, #tpu.memory_space<vmem>>, %arg5: memref<4x512xf32, #tpu.memory_space<vmem>>) attributes {dimension_semantics = [#tpu.dimension_semantics<parallel>], iteration_bounds = array<i64: 1>, scalar_prefetch = 0 : i64, scratch_operands = 0 : i64, tpu.core_type = #tpu.core_type<tc>, window_params = [{transform_indices = @transform_0, window_bounds = array<i64: 4, 512>}, {transform_indices = @transform_1, window_bounds = array<i64: 4, 512>}, {transform_indices = @transform_2, window_bounds = array<i64: 4, 512>}, {transform_indices = @transform_3, window_bounds = array<i64: 4, 512>}, {transform_indices = @transform_4, window_bounds = array<i64: 4, 512>}]} {
    %c0 = arith.constant 0 : index
    %c0_0 = arith.constant 0 : index
    %0 = vector.load %arg4[%c0, %c0_0] : memref<4x512xf32, #tpu.memory_space<vmem>>, vector<4x512xf32>
    %c0_1 = arith.constant 0 : index
    %c0_2 = arith.constant 0 : index
    %1 = vector.load %arg1[%c0_1, %c0_2] : memref<4x512xf32, #tpu.memory_space<vmem>>, vector<4x512xf32>
    %2 = arith.mulf %0, %1 : vector<4x512xf32>
    %c0_3 = arith.constant 0 : index
    %c0_4 = arith.constant 0 : index
    %3 = vector.load %arg2[%c0_3, %c0_4] : memref<4x512xf32, #tpu.memory_space<vmem>>, vector<4x512xf32>
    %4 = arith.mulf %2, %3 : vector<4x512xf32>
    %c0_5 = arith.constant 0 : index
    %c0_6 = arith.constant 0 : index
    %5 = vector.load %arg3[%c0_5, %c0_6] : memref<4x512xf32, #tpu.memory_space<vmem>>, vector<4x512xf32>
    %6 = arith.mulf %4, %5 : vector<4x512xf32>
    %c0_7 = arith.constant 0 : index
    %c0_8 = arith.constant 0 : index
    %7 = vector.load %arg5[%c0_7, %c0_8] : memref<4x512xf32, #tpu.memory_space<vmem>>, vector<4x512xf32>
    tpu.vector_store %arg5[%c0_7, %c0_8], %6 {strides = array<i32>} : memref<4x512xf32, #tpu.memory_space<vmem>>, vector<4x512xf32>,
    return
  }
  func.func @transform_0(%arg0: i32) -> (i32, i32) {
    %c0_i32 = arith.constant 0 : i32
    %c0_i32_0 = arith.constant 0 : i32
    return %arg0, %c0_i32 : i32, i32
  }
  func.func @transform_1(%arg0: i32) -> (i32, i32) {
    %c0_i32 = arith.constant 0 : i32
    %c0_i32_0 = arith.constant 0 : i32
    return %arg0, %c0_i32 : i32, i32
  }
  func.func @transform_2(%arg0: i32) -> (i32, i32) {
    %c0_i32 = arith.constant 0 : i32
    %c0_i32_0 = arith.constant 0 : i32
    return %arg0, %c0_i32 : i32, i32
  }
  func.func @transform_3(%arg0: i32) -> (i32, i32) {
    %c0_i32 = arith.constant 0 : i32
    %c0_i32_0 = arith.constant 0 : i32
    return %arg0, %c0_i32 : i32, i32
  }
  func.func @transform_4(%arg0: i32) -> (i32, i32) {
    %c0_i32 = arith.constant 0 : i32
    %c0_i32_0 = arith.constant 0 : i32
    return %arg0, %c0_i32 : i32, i32
  }
}

</mosaic_0001>

<bundles_post_ra>
// kernel: tpu_custom_call.1
= control target key start
LH: loop header
LB: loop body
LE: loop exit
PB: predicated region body
PF: predicated region fallthrough
CT: control target
= control target key end

     0   :  { %9 = vsyncpa [#allocation3], 0  ;;  %s311_s0 = inlined_call_operand.hbm [shape: f32[4,512], index: 0, kind: input, shape index: {}]   ;;  %s312_s1 = inlined_call_operand.hbm [shape: f32[4,512], index: 1, kind: input, shape index: {}]   ;;  %s313_s2 = inlined_call_operand.hbm [shape: f32[4,512], index: 2, kind: input, shape index: {}]   ;;  %s314_s3 = inlined_call_operand.hbm [shape: f32[4,512], index: 3, kind: input, shape index: {}]   ;;  %s315_s4 = inlined_call_operand.hbm [shape: f32[4,512], index: 4, kind: output, shape index: {}]  }
   0x1   :  { %10 = vsyncpa [#allocation6], 0 }
   0x2   :  { %11 = vsyncpa [#allocation9], 0 }
   0x3   :  { %12 = vsyncpa [#allocation4], 0  ;;  %s221_s15 = smov [#allocation5]   ;;  %s222_s17 = smov [#allocation2]  }
   0x4   :  { %s29_s16 = sshll.u32 %s221_s15, 4  ;;  %s19_s18 = sshll.u32 %s222_s17, 4  ;;  %s30_s16 = int_to_ptr.vmem [resolvable:$true] %s29_s16  ;;  %s20_s18 = int_to_ptr.vmem [resolvable:$true] %s19_s18 }
   0x5   :  { %s103_s21 = scalar_lea.hbm %s312_s1, 256 }
   0x6   :  { %p104_p0 = scmp.ne.s32.totalorder %s312_s1, %s103_s21  ;;  %p107_p1 = scmp.lt.u32.totalorder %s103_s21, %s312_s1 }
   0x8   :  { %p109_p2 = pnand %p107_p1, %p104_p0 }
   0xa   :  { %112 = shalt.err (!%p109_p2)
}
   0xb   :  { %s113_s26 = scalar_lea.vmem %s30_s16, 256  ;;  %p118_p4 = scmp.lt.s32.totalorder %s30_s16, %s30_s16 }
   0xc   :  { %p114_p3 = scmp.ne.s32.totalorder %s30_s16, %s113_s26  ;;  %p119_p5 = scmp.lt.s32.totalorder %s113_s26, %s113_s26 }
   0xe   :  { %p120_p6 = por %p119_p5, %p118_p4 }
  0x10   :  { %p121_p7 = pnand %p120_p6, %p114_p3 }
  0x12   :  { %124 = shalt.err (!%p121_p7)
}
  0x13   :  { %32 = dma.hbm_to_vmem [thread:$0]  %s312_s1, 256, %s30_s16, [#allocation6]  }
  0x14   :  { %s125_s5 = scalar_lea.hbm %s311_s0, 256 }
  0x15   :  { %p126_p8 = scmp.ne.s32.totalorder %s311_s0, %s125_s5  ;;  %p129_p9 = scmp.lt.u32.totalorder %s125_s5, %s311_s0 }
  0x17   :  { %p131_p10 = pnand %p129_p9, %p126_p8 }
  0x19   :  { %134 = shalt.err (!%p131_p10)
}
  0x1a   :  { %s135_s10 = scalar_lea.vmem %s20_s18, 256  ;;  %p140_p12 = scmp.lt.s32.totalorder %s20_s18, %s20_s18 }
  0x1b   :  { %p136_p11 = scmp.ne.s32.totalorder %s20_s18, %s135_s10  ;;  %p141_p13 = scmp.lt.s32.totalorder %s135_s10, %s135_s10 }
  0x1d   :  { %p142_p0 = por %p141_p13, %p140_p12 }
  0x1f   :  { %p143_p1 = pnand %p142_p0, %p136_p11 }
  0x21   :  { %146 = shalt.err (!%p143_p1)
}
  0x22   :  { %22 = dma.hbm_to_vmem [thread:$0]  %s311_s0, 256, %s20_s18, [#allocation3]  }
  0x23   :  { %s223_s12 = smov [#allocation7]   ;;  %s224_s14 = smov [#allocation8]  }
  0x24   :  { %s39_s13 = sshll.u32 %s223_s12, 4  ;;  %s49_s15 = sshll.u32 %s224_s14, 4  ;;  %s40_s13 = int_to_ptr.vmem [resolvable:$true] %s39_s13  ;;  %s50_s15 = int_to_ptr.vmem [resolvable:$true] %s49_s15 }
  0x25   :  { %s147_s19 = scalar_lea.hbm %s313_s2, 256 }
  0x26   :  { %p148_p2 = scmp.ne.s32.totalorder %s313_s2, %s147_s19  ;;  %p151_p3 = scmp.lt.u32.totalorder %s147_s19, %s313_s2 }
  0x28   :  { %p153_p4 = pnand %p151_p3, %p148_p2 }
  0x2a   :  { %156 = shalt.err (!%p153_p4)
}
  0x2b   :  { %s157_s0 = scalar_lea.vmem %s40_s13, 256  ;;  %p162_p6 = scmp.lt.s32.totalorder %s40_s13, %s40_s13 }
  0x2c   :  { %p158_p5 = scmp.ne.s32.totalorder %s40_s13, %s157_s0  ;;  %p163_p7 = scmp.lt.s32.totalorder %s157_s0, %s157_s0 }
  0x2e   :  { %p164_p8 = por %p163_p7, %p162_p6 }
  0x30   :  { %p165_p9 = pnand %p164_p8, %p158_p5 }
  0x32   :  { %168 = shalt.err (!%p165_p9)
}
  0x33   :  { %42 = dma.hbm_to_vmem [thread:$0]  %s313_s2, 256, %s40_s13, [#allocation6]  }
  0x34   :  { %s169_s27 = scalar_lea.hbm %s314_s3, 256 }
  0x35   :  { %p170_p10 = scmp.ne.s32.totalorder %s314_s3, %s169_s27  ;;  %p173_p11 = scmp.lt.u32.totalorder %s169_s27, %s314_s3 }
  0x37   :  { %p175_p12 = pnand %p173_p11, %p170_p10 }
  0x39   :  { %178 = shalt.err (!%p175_p12)
}
  0x3a   :  { %s179_s6 = scalar_lea.vmem %s50_s15, 256  ;;  %p184_p0 = scmp.lt.s32.totalorder %s50_s15, %s50_s15 }
  0x3b   :  { %p180_p13 = scmp.ne.s32.totalorder %s50_s15, %s179_s6  ;;  %p185_p1 = scmp.lt.s32.totalorder %s179_s6, %s179_s6 }
  0x3d   :  { %p186_p2 = por %p185_p1, %p184_p0 }
  0x3f   :  { %p187_p3 = pnand %p186_p2, %p180_p13 }
  0x41   :  { %190 = shalt.err (!%p187_p3)
}
  0x42   :  { %52 = dma.hbm_to_vmem [thread:$0]  %s314_s3, 256, %s50_s15, [#allocation9]  }
  0x43   :  { %213 = dma.done.wait [#allocation3], 256  }
  0x44   :  { %214 = vsyncadd [#allocation3], 4294967040 }
  0x45   :  { %215 = dma.done.wait [#allocation6], 512  }
  0x46   :  { %216 = vsyncadd [#allocation6], 4294966784 }
  0x47   :  { %217 = dma.done.wait [#allocation9], 256  }
  0x48   :  { %218 = vsyncadd [#allocation9], 4294967040  ;;  %v65_v0 = vld [vmem:[#allocation8] sm:$0xff]  ;;  %v67_v1 = vld [vmem:[#allocation2] sm:$0xff]  ;;  %s225_s8 = smov [#allocation10]  }
  0x49   :  { %v71_v2 = vld [vmem:[#allocation5] sm:$0xff]  ;;  %v69_v3 = vmul.f32 %v67_v1, %v65_v0  ;;  %v66_v4 = vld [vmem:[#allocation8 + $0x8] sm:$0xff]  ;;  %v68_v5 = vld [vmem:[#allocation2 + $0x8] sm:$0xff]  ;;  %s87_s9 = sshll.u32 %s225_s8, 4  ;;  %s88_s9 = int_to_ptr.vmem [resolvable:$true] %s87_s9 }
  0x4a   :  { %v75_v6 = vld [vmem:[#allocation7] sm:$0xff]  ;;  %v70_v7 = vmul.f32 %v68_v5, %v66_v4  ;;  %v72_v8 = vld [vmem:[#allocation5 + $0x8] sm:$0xff]  ;;  %v76_v10 = vld [vmem:[#allocation7 + $0x8] sm:$0xff]  ;;  %s191_s3 = scalar_lea.vmem %s88_s9, 256  ;;  %p196_p5 = scmp.lt.s32.totalorder %s88_s9, %s88_s9 }
  0x4b   :  { %v73_v9 = vmul.f32 %v71_v2, %v69_v3  ;;  %p192_p4 = scmp.ne.s32.totalorder %s88_s9, %s191_s3  ;;  %p197_p6 = scmp.lt.s32.totalorder %s191_s3, %s191_s3 }
  0x4c   :  { %v74_v11 = vmul.f32 %v72_v8, %v70_v7 }
  0x4d   :  { %v77_v12 = vmul.f32 %v75_v6, %v73_v9  ;;  %p198_p7 = por %p197_p6, %p196_p5 }
  0x4e   :  { %v78_v13 = vmul.f32 %v76_v10, %v74_v11 }
  0x4f   :  { %79 = vst [vmem:[#allocation10] sm:$0xff] %v77_v12  ;;  %p199_p8 = pnand %p198_p7, %p192_p4 }
  0x50   :  { %80 = vst [vmem:[#allocation10 + $0x8] sm:$0xff] %v78_v13 }
  0x51   :  { %202 = shalt.err (!%p199_p8)
}
  0x52   :  { %s203_s11 = scalar_lea.hbm %s315_s4, 256 }
  0x53   :  { %p204_p9 = scmp.ne.s32.totalorder %s315_s4, %s203_s11  ;;  %p207_p10 = scmp.lt.u32.totalorder %s203_s11, %s315_s4 }
  0x55   :  { %p209_p11 = pnand %p207_p10, %p204_p9 }
  0x57   :  { %212 = shalt.err (!%p209_p11)
}
  0x58   :  { %90 = dma.vmem_to_hbm [thread:$0]  %s88_s9, 256, %s315_s4, [#allocation4]  }
  0x59   :  { %219 = dma.done.wait [#allocation4], 256  }
  0x5a   :  { %220 = vsyncadd [#allocation4], 4294967040 }
  0x5b   :  { %94 = vsyncpa [#allocation3], 1 }
  0x5c   :  { %95 = vsyncpa [#allocation6], 1 }
  0x5d   :  { %96 = vsyncpa [#allocation9], 1 }
  0x5e   :  { %97 = vsyncpa [#allocation4], 1 }

</bundles_post_ra>
